<compile_context>
chip_gen: v7x
topology: tpu7x:2x2x1
jax: 0.10.0
libtpu: 0.0.40
codegen_flags: <defaults>
</compile_context>

<pallas_src>
import math

import jax
import jax.numpy as jnp
from jax.experimental import pallas as pl
from jax.experimental.pallas import tpu as pltpu


def _flatten_dma_kernel(x_hbm, o_hbm, sem):
    # x_hbm / o_hbm: raw HBM refs of shape (num_chunks, chunk_elems).
    # Copy this grid step's chunk directly HBM -> HBM, no VMEM transit.
    i = pl.program_id(0)
    cp = pltpu.make_async_copy(x_hbm.at[i], o_hbm.at[i], sem)
    cp.start()
    cp.wait()


def flatten(x: jax.Array) -> jax.Array:
    """Equivalent of torch: x.view(x.size(0), -1)."""
    n = x.shape[0]
    feat = math.prod(x.shape[1:]) if x.ndim > 1 else 1
    total = n * feat
    itemsize = jnp.dtype(x.dtype).itemsize

    # Split the flat copy into 2 equal chunks when possible so v7x's two
    # TensorCores each drive one DMA; fall back to a single bulk DMA otherwise.
    num_chunks = 2 if (total >= 2 and total % 2 == 0) else 1
    chunk_elems = total // num_chunks

    # Metadata-only reshapes (no data movement in XLA).
    x_chunks = x.reshape(num_chunks, chunk_elems)

    out = pl.pallas_call(
        _flatten_dma_kernel,
        out_shape=jax.ShapeDtypeStruct((num_chunks, chunk_elems), x.dtype),
        grid_spec=pltpu.PrefetchScalarGridSpec(
            num_scalar_prefetch=0,
            grid=(num_chunks,),
            in_specs=[pl.BlockSpec(memory_space=pl.ANY)],
            out_specs=pl.BlockSpec(memory_space=pl.ANY),
            scratch_shapes=[pltpu.SemaphoreType.DMA(())],
        ),
        compiler_params=pltpu.CompilerParams(
            dimension_semantics=("parallel",),
            has_side_effects=True,
        ),
        # Pure-bandwidth op: tell XLA's scheduler so it can overlap neighbors.
        cost_estimate=pl.CostEstimate(
            flops=0,
            transcendentals=0,
            bytes_accessed=2 * total * itemsize,
        ),
    )(x_chunks)

    # Metadata-only reshape back to the flattened (batch, features) view.
    return out.reshape(n, feat)


if __name__ == "__main__":
    key = jax.random.PRNGKey(0)
    # Small NCHW input consistent with a conv-net feature map.
    x = jax.random.normal(key, (2, 4, 16, 16), dtype=jnp.float32)

    y = flatten(x)
    jax.block_until_ready(y)

    # Sanity check against the reference semantics (torch .view == reshape here).
    y_ref = x.reshape(x.shape[0], -1)
    assert y.shape == (2, 4 * 16 * 16), y.shape
    assert y.dtype == x.dtype
    assert bool(jnp.array_equal(y, y_ref))

    print("KERNEL_OK")
</pallas_src>

<mosaic_0001>
module attributes {stable_mosaic.version = 11 : i64} {
  func.func @_flatten_dma_kernel(%arg0: i32, %arg1: memref<2x1024xf32, #tpu.memory_space<any>>, %arg2: memref<2x1024xf32, #tpu.memory_space<any>>, %arg3: memref<!tpu.dma_semaphore, #tpu.memory_space<semaphore_mem>>) attributes {dimension_semantics = [#tpu.dimension_semantics<parallel>], iteration_bounds = array<i64: 2>, scalar_prefetch = 0 : i64, scratch_operands = 1 : i64, tpu.core_type = #tpu.core_type<tc>, window_params = [{}, {}]} {
    %c0_i32 = arith.constant 0 : i32
    %0 = tpu.memref_slice %arg1[%arg0, %c0_i32] : memref<2x1024xf32, #tpu.memory_space<any>> -> memref<1x1024xf32, #tpu.memory_space<any>>
    %1 = tpu.memref_squeeze %0 : memref<1x1024xf32, #tpu.memory_space<any>> -> memref<1024xf32, #tpu.memory_space<any>>
    %c0_i32_0 = arith.constant 0 : i32
    %2 = tpu.memref_slice %arg2[%arg0, %c0_i32_0] : memref<2x1024xf32, #tpu.memory_space<any>> -> memref<1x1024xf32, #tpu.memory_space<any>>
    %3 = tpu.memref_squeeze %2 : memref<1x1024xf32, #tpu.memory_space<any>> -> memref<1024xf32, #tpu.memory_space<any>>
    tpu.enqueue_dma source(%1 : memref<1024xf32, #tpu.memory_space<any>>) target(%3 : memref<1024xf32, #tpu.memory_space<any>>) target_semaphore(%arg3 : memref<!tpu.dma_semaphore, #tpu.memory_space<semaphore_mem>>)
    %c0_i32_1 = arith.constant 0 : i32
    %4 = tpu.memref_slice %arg1[%arg0, %c0_i32_1] : memref<2x1024xf32, #tpu.memory_space<any>> -> memref<1x1024xf32, #tpu.memory_space<any>>
    %5 = tpu.memref_squeeze %4 : memref<1x1024xf32, #tpu.memory_space<any>> -> memref<1024xf32, #tpu.memory_space<any>>
    %c0_i32_2 = arith.constant 0 : i32
    %6 = tpu.memref_slice %arg2[%arg0, %c0_i32_2] : memref<2x1024xf32, #tpu.memory_space<any>> -> memref<1x1024xf32, #tpu.memory_space<any>>
    %7 = tpu.memref_squeeze %6 : memref<1x1024xf32, #tpu.memory_space<any>> -> memref<1024xf32, #tpu.memory_space<any>>
    tpu.wait_dma2 semaphore(%arg3 : memref<!tpu.dma_semaphore, #tpu.memory_space<semaphore_mem>>) src(%5 : memref<1024xf32, #tpu.memory_space<any>>) dst(%7 : memref<1024xf32, #tpu.memory_space<any>>)
    return
  }
}

</mosaic_0001>

<bundles_post_ra>
// kernel: tpu_custom_call.1
= control target key start
LH: loop header
LB: loop body
LE: loop exit
PB: predicated region body
PF: predicated region fallthrough
CT: control target
= control target key end

     0   :  { %s84_s6 = smov 0   ;;  %s109_s0 = inlined_call_operand.hbm [shape: f32[2,1024], index: 0, kind: input, shape index: {}]   ;;  %s110_s1 = inlined_call_operand.hbm [shape: f32[2,1024], index: 1, kind: output, shape index: {}]  }
   0x1 LB: > { %s13_s7 = sshrl.u32 %s86_s6, 1  ;;  %s14_s8 = sand.u32 1, %s86_s6   ;;  %s86_s6 = sphi %s84_s6, %s11_s6  }
   0x2   : > { %s61_s9 = sshll.u32 %s13_s7, 4  ;;  %s88_s11 = smov 32  }
   0x3   : > { %s16_s10 = sadd.s32 %s61_s9, %s14_s8  ;;  %33 = sst [smem:[#allocation4]] %s88_s11 }
   0x4   : > { %s62_s12 = sshll.u32 %s16_s10, 4  ;;  %35 = sst [smem:[#allocation4 + $0x1]] %s88_s11 }
   0x5   : > { %s18_s15 = scalar_lea.hbm %s109_s0, %s62_s12  ;;  %s20_s18 = scalar_lea.hbm %s110_s1, %s62_s12 }
   0x6   : > { %s89_s19 = smov 1   ;;  %s90_s20 = smov [#allocation2]  }
   0x7   : > { %37 = sst [smem:[#allocation4 + $0x2]] %s89_s19  ;;  %s91_s21 = smov [#allocation3]  }
   0x8   : > { %s92_s22 = smov 0  }
   0x9   : > { %39 = dma.general %s18_s15, 128, %s20_s18, %s90_s20, %s91_s21, [#allocation4], %s92_s22, 0  }
   0xa   : > { %82 = dma.done.wait [#allocation2], 128 }
   0xb   : > { %83 = vsyncadd [#allocation2], 4294967168  ;;  %s11_s6 = sadd.s32 1, %s86_s6  }
   0xc   : > { %p8_p0 = scmp.ge.s32.totalorder %s11_s6, 2  }
   0xe   :  { %10 = sbr.rel (!%p8_p0) target bundleno = 1 (0x1), region = 23 }
  0x15   :  { %42 = vsyncmov [#allocation2] }
  0x18   :  { %s43_s23 = vpop.sfrf %42 }
  0x19   :  { %p64_p1 = scmp.ne.s32.totalorder %s43_s23, 0 }
  0x1b   :  { %47 = shalt.err (%p64_p1)  }

</bundles_post_ra>
